<compile_context>
chip_gen: v5e
topology: v5e:2x2
jax: 0.10.0
libtpu: 0.0.40
codegen_flags: <defaults>
</compile_context>

<pallas_src>
import functools

import jax
import jax.numpy as jnp
from jax.experimental import pallas as pl
from jax.experimental.pallas import tpu as pltpu

_MIB = 1024 * 1024


def _round_up(x, m):
    return ((x + m - 1) // m) * m


def _distill_partial_kernel(logits_ref, labels_ref, s_emb_ref, t_emb_ref,
                            out_ref, *, batch, tile_rows):
    """Per-batch-tile partial sums: CE sum, valid-label count, MSE sum."""
    pid = pl.program_id(0)

    logits = logits_ref[...].astype(jnp.float32)          # [TB, L]
    labels = labels_ref[...]                               # [TB, 1] int32
    tb, num_labels = logits.shape

    # Row-validity mask for the (possibly padded) last block.
    row_ids = jax.lax.broadcasted_iota(jnp.int32, (tb, 1), 0) + pid * tile_rows
    in_range = row_ids < batch                              # [TB, 1] bool
    ce_valid = jnp.logical_and(in_range, labels != -100)    # ignore_index=-100

    # ---- fused, numerically-stable cross-entropy (partial sums) ----
    row_max = jnp.max(logits, axis=-1, keepdims=True)       # [TB, 1]
    shifted = logits - row_max                               # [TB, L]
    lse = jnp.log(jnp.sum(jnp.exp(shifted), axis=-1, keepdims=True))   # [TB, 1]
    col_ids = jax.lax.broadcasted_iota(jnp.int32, (tb, num_labels), 1)
    picked = jnp.sum(jnp.where(col_ids == labels, shifted, 0.0),
                     axis=-1, keepdims=True)                 # [TB, 1]
    ce_part = jnp.sum(jnp.where(ce_valid, lse - picked, 0.0))            # scalar
    cnt_part = jnp.sum(ce_valid.astype(jnp.float32))                     # scalar

    # ---- MSE (partial sum of squared diffs) ----
    diff = s_emb_ref[...].astype(jnp.float32) - t_emb_ref[...].astype(jnp.float32)
    sq_rows = jnp.sum(diff * diff, axis=-1, keepdims=True)   # [TB, 1]
    mse_part = jnp.sum(jnp.where(in_range, sq_rows, 0.0))                 # scalar

    # Single merged lane-dense splat output block:
    #   lanes [0,128) -> CE sum, [128,256) -> valid count, [256,384) -> MSE sum.
    lane = jax.lax.broadcasted_iota(jnp.int32, out_ref.shape, 2)
    out_ref[...] = jnp.where(
        lane < 128, ce_part,
        jnp.where(lane < 256, cnt_part, mse_part)).astype(jnp.float32)


def _generation_vmem_limit():
    """Generation-aware scoped-VMEM limit with a safe fallback."""
    cap = None
    try:
        cap = getattr(pltpu.get_tpu_info(), "vmem_capacity_bytes", None)
    except Exception:
        cap = None
    if cap is None:
        return 32 * _MIB                      # conservative, always-safe default
    if cap >= 128 * _MIB:                     # v5e / v6e: 128 MiB physical
        return 96 * _MIB
    if cap >= 64 * _MIB:                      # v7x: 64 MiB per TensorCore
        return 40 * _MIB
    return max(16 * _MIB, (3 * cap) // 4)


def _pick_tile_rows(batch, num_labels, hidden, logit_dtype, emb_dtype,
                    vmem_limit_bytes, row_align):
    """Largest batch tile whose working set fits ~80% of the scoped VMEM limit,
    capped so the grid keeps >= ~8 blocks for pipelining / megacore sharding."""
    pad_l = _round_up(num_labels, 128)
    pad_h = _round_up(hidden, 128)
    logit_b = jnp.dtype(logit_dtype).itemsize
    emb_b = jnp.dtype(emb_dtype).itemsize
    # Double-buffered input blocks (labels pad to 128 lanes of i32 in VMEM).
    in_row = 2 * (pad_l * logit_b + 128 * 4 + 2 * pad_h * emb_b)
    # Live f32/i32 temporaries: upcast logits / shifted / exp / col_ids ([TB,L])
    # plus upcast embeddings & diff ([TB,H]).
    tmp_row = 4 * pad_l * 4 + 3 * pad_h * 4
    per_row = max(in_row + tmp_row, 1)

    budget = int(0.8 * vmem_limit_bytes)       # leave ~20% compiler headroom
    tile = max(row_align, budget // per_row)
    # Keep >= ~8 blocks so DMA overlaps compute and both v7x TCs stay busy.
    tile = min(tile, max(row_align, -(-batch // 8)))
    tile = max(row_align, (tile // row_align) * row_align)
    # Never exceed one sublane-aligned full-batch block.
    tile = min(tile, _round_up(batch, row_align))
    return int(tile)


def distillation_loss(student_logits, student_embeddings, teacher_embeddings,
                      labels, *, alpha_ce=0.5, alpha_mse=0.5, temperature=2.0,
                      tile_rows=None, vmem_limit_bytes=None):
    """Returns (total_loss, loss_cls, loss_emb) as float32 scalars."""
    del temperature  # signature parity; the reference forward never uses it.

    batch, num_labels = student_logits.shape
    _, hidden = student_embeddings.shape
    labels_2d = labels.astype(jnp.int32).reshape(batch, 1)

    # bf16 inputs pack 2 rows per sublane -> 16-row alignment avoids masking.
    row_align = 16 if (jnp.dtype(student_embeddings.dtype).itemsize == 2
                       or jnp.dtype(student_logits.dtype).itemsize == 2) else 8

    gen_limit = _generation_vmem_limit()
    if vmem_limit_bytes is None:
        vmem_limit_bytes = gen_limit
    else:
        vmem_limit_bytes = int(min(vmem_limit_bytes, gen_limit))

    if tile_rows is None:
        tile_rows = _pick_tile_rows(batch, num_labels, hidden,
                                    student_logits.dtype,
                                    student_embeddings.dtype,
                                    vmem_limit_bytes, row_align)
    else:
        tile_rows = int(tile_rows)
        if tile_rows < batch:
            tile_rows = max(row_align, (tile_rows // row_align) * row_align)
        else:
            tile_rows = min(tile_rows, _round_up(batch, row_align))

    nblocks = (batch + tile_rows - 1) // tile_rows
    # Prefer an even block count (v7x megacore balance) when it comes for free.
    if nblocks > 1 and nblocks % 2 == 1:
        alt = _round_up(-(-batch // (nblocks + 1)), row_align)
        if row_align <= alt <= tile_rows and (-(-batch // alt)) % 2 == 0:
            tile_rows = alt
            nblocks = -(-batch // alt)

    kernel = functools.partial(_distill_partial_kernel,
                               batch=batch, tile_rows=tile_rows)

    bytes_accessed = int(
        student_logits.size * student_logits.dtype.itemsize
        + labels_2d.size * 4
        + (student_embeddings.size + teacher_embeddings.size)
        * student_embeddings.dtype.itemsize
        + nblocks * 8 * 384 * 4)
    cost = pl.CostEstimate(
        flops=int(5 * batch * num_labels + 3 * batch * hidden),
        transcendentals=int(batch * num_labels + batch),
        bytes_accessed=bytes_accessed)

    partials = pl.pallas_call(
        kernel,
        out_shape=jax.ShapeDtypeStruct((nblocks, 8, 384), jnp.float32),
        grid=(nblocks,),
        in_specs=[
            pl.BlockSpec((tile_rows, num_labels), lambda i: (i, 0)),  # logits
            pl.BlockSpec((tile_rows, 1), lambda i: (i, 0)),           # labels
            pl.BlockSpec((tile_rows, hidden), lambda i: (i, 0)),      # student emb
            pl.BlockSpec((tile_rows, hidden), lambda i: (i, 0)),      # teacher emb
        ],
        out_specs=pl.BlockSpec((1, 8, 384), lambda i: (i, 0, 0)),
        compiler_params=pltpu.CompilerParams(
            dimension_semantics=("parallel",),
            vmem_limit_bytes=int(vmem_limit_bytes)),
        cost_estimate=cost,
    )(student_logits, labels_2d, student_embeddings, teacher_embeddings)

    # Tiny final reduction + weighted combine (keeps the grid axis parallel).
    ce_sum = jnp.sum(partials[:, 0, 0])
    ce_cnt = jnp.sum(partials[:, 0, 128])
    mse_sum = jnp.sum(partials[:, 0, 256])
    loss_cls = ce_sum / ce_cnt                        # mean over non-ignored labels
    loss_emb = mse_sum / jnp.float32(batch * hidden)
    total = jnp.float32(alpha_ce) * loss_cls + jnp.float32(alpha_mse) * loss_emb
    return total, loss_cls, loss_emb


def _reference(logits, s_emb, t_emb, labels, alpha_ce=0.5, alpha_mse=0.5):
    logits = logits.astype(jnp.float32)
    s_emb = s_emb.astype(jnp.float32)
    t_emb = t_emb.astype(jnp.float32)
    b = logits.shape[0]
    valid = labels != -100
    log_probs = jax.nn.log_softmax(logits, axis=-1)
    picked = log_probs[jnp.arange(b), jnp.where(valid, labels, 0)]
    ce = -jnp.sum(jnp.where(valid, picked, 0.0)) / jnp.sum(valid.astype(jnp.float32))
    mse = jnp.mean((s_emb - t_emb) ** 2)
    return alpha_ce * ce + alpha_mse * mse, ce, mse


if __name__ == "__main__":
    key = jax.random.PRNGKey(0)

    # ---- Test 1: f32 inputs, batch not a multiple of the tile (masked block) ----
    B, L, H = 20, 16, 32
    k1, k2, k3, k4, k5, k6, k7, k8 = jax.random.split(key, 8)
    logits = jax.random.normal(k1, (B, L), dtype=jnp.float32)
    s_emb = jax.random.normal(k2, (B, H), dtype=jnp.float32)
    t_emb = jax.random.normal(k3, (B, H), dtype=jnp.float32)
    labels = jax.random.randint(k4, (B,), 0, L, dtype=jnp.int32)

    total, lc, le = distillation_loss(logits, s_emb, t_emb, labels,
                                      alpha_ce=0.5, alpha_mse=0.5,
                                      temperature=2.0)
    jax.block_until_ready((total, lc, le))
    r_total, r_lc, r_le = _reference(logits, s_emb, t_emb, labels)
    assert jnp.allclose(total, r_total, atol=1e-5), (total, r_total)
    assert jnp.allclose(lc, r_lc, atol=1e-5), (lc, r_lc)
    assert jnp.allclose(le, r_le, atol=1e-5), (le, r_le)

    # ---- Test 2: bf16 embeddings, odd batch, one ignore_index=-100 label ----
    B2, L2, H2 = 37, 24, 64
    logits2 = jax.random.normal(k5, (B2, L2), dtype=jnp.float32)
    s_emb2 = jax.random.normal(k6, (B2, H2), dtype=jnp.float32).astype(jnp.bfloat16)
    t_emb2 = jax.random.normal(k7, (B2, H2), dtype=jnp.float32).astype(jnp.bfloat16)
    labels2 = jax.random.randint(k8, (B2,), 0, L2, dtype=jnp.int32)
    labels2 = labels2.at[3].set(-100)

    total2, lc2, le2 = distillation_loss(logits2, s_emb2, t_emb2, labels2,
                                         alpha_ce=0.25, alpha_mse=0.75)
    jax.block_until_ready((total2, lc2, le2))
    r_total2, r_lc2, r_le2 = _reference(logits2, s_emb2, t_emb2, labels2,
                                        alpha_ce=0.25, alpha_mse=0.75)
    assert jnp.allclose(total2, r_total2, atol=1e-4), (total2, r_total2)
    assert jnp.allclose(lc2, r_lc2, atol=1e-4), (lc2, r_lc2)
    assert jnp.allclose(le2, r_le2, atol=1e-4), (le2, r_le2)

    print("KERNEL_OK")
</pallas_src>

<mosaic_0001>
module attributes {stable_mosaic.version = 11 : i64} {
  func.func @_distill_partial_kernel(%arg0: i32, %arg1: memref<8x16xf32, #tpu.memory_space<vmem>>, %arg2: memref<8x1xi32, #tpu.memory_space<vmem>>, %arg3: memref<8x32xf32, #tpu.memory_space<vmem>>, %arg4: memref<8x32xf32, #tpu.memory_space<vmem>>, %arg5: memref<1x8x384xf32, #tpu.memory_space<vmem>>) attributes {dimension_semantics = [#tpu.dimension_semantics<parallel>], iteration_bounds = array<i64: 3>, scalar_prefetch = 0 : i64, scratch_operands = 0 : i64, tpu.core_type = #tpu.core_type<tc>, window_params = [{transform_indices = @transform_0, window_bounds = array<i64: 8, 16>}, {transform_indices = @transform_1, window_bounds = array<i64: 8, 1>}, {transform_indices = @transform_2, window_bounds = array<i64: 8, 32>}, {transform_indices = @transform_3, window_bounds = array<i64: 8, 32>}, {transform_indices = @transform_4, window_bounds = array<i64: 1, 8, 384>}]} {
    %c0 = arith.constant 0 : index
    %c0_0 = arith.constant 0 : index
    %0 = vector.load %arg1[%c0, %c0_0] : memref<8x16xf32, #tpu.memory_space<vmem>>, vector<8x16xf32>
    %c0_1 = arith.constant 0 : index
    %c0_2 = arith.constant 0 : index
    %1 = vector.load %arg2[%c0_1, %c0_2] : memref<8x1xi32, #tpu.memory_space<vmem>>, vector<8x1xi32>
    %2 = tpu.iota {dimensions = array<i32: 0>} : vector<8x1xi32>
    %c8_i32 = arith.constant 8 : i32
    %3 = arith.muli %arg0, %c8_i32 : i32
    %4 = vector.broadcast %3 : i32 to vector<8x1xi32>
    %5 = arith.addi %2, %4 : vector<8x1xi32>
    %c20_i32 = arith.constant 20 : i32
    %6 = vector.broadcast %c20_i32 : i32 to vector<8x1xi32>
    %7 = arith.cmpi slt, %5, %6 : vector<8x1xi32>
    %c-100_i32 = arith.constant -100 : i32
    %8 = vector.broadcast %c-100_i32 : i32 to vector<8x1xi32>
    %9 = arith.cmpi ne, %1, %8 : vector<8x1xi32>
    %10 = arith.andi %7, %9 : vector<8x1xi1>
    %cst = arith.constant dense<0xFF800000> : vector<8xf32>
    %11 = vector.multi_reduction <maximumf>, %0, %cst [1] : vector<8x16xf32> to vector<8xf32>
    %12 = vector.shape_cast %11 : vector<8xf32> to vector<8x1xf32>
    %13 = vector.broadcast %12 : vector<8x1xf32> to vector<8x16xf32>
    %14 = arith.subf %0, %13 : vector<8x16xf32>
    %15 = math.exp %14 : vector<8x16xf32>
    %cst_3 = arith.constant dense<0.000000e+00> : vector<8xf32>
    %16 = vector.multi_reduction <add>, %15, %cst_3 [1] : vector<8x16xf32> to vector<8xf32>
    %17 = vector.shape_cast %16 : vector<8xf32> to vector<8x1xf32>
    %18 = math.log %17 : vector<8x1xf32>
    %19 = tpu.iota {dimensions = array<i32: 1>} : vector<8x16xi32>
    %20 = vector.broadcast %1 : vector<8x1xi32> to vector<8x16xi32>
    %21 = arith.cmpi eq, %19, %20 : vector<8x16xi32>
    %cst_4 = arith.constant 0.000000e+00 : f32
    %22 = vector.broadcast %cst_4 : f32 to vector<8x16xf32>
    %23 = arith.select %21, %14, %22 : vector<8x16xi1>, vector<8x16xf32>
    %cst_5 = arith.constant dense<0.000000e+00> : vector<8xf32>
    %24 = vector.multi_reduction <add>, %23, %cst_5 [1] : vector<8x16xf32> to vector<8xf32>
    %25 = vector.shape_cast %24 : vector<8xf32> to vector<8x1xf32>
    %26 = arith.subf %18, %25 : vector<8x1xf32>
    %cst_6 = arith.constant 0.000000e+00 : f32
    %27 = vector.broadcast %cst_6 : f32 to vector<8x1xf32>
    %28 = arith.select %10, %26, %27 : vector<8x1xi1>, vector<8x1xf32>
    %29 = vector.shape_cast %28 : vector<8x1xf32> to vector<1x8x1xf32>
    %cst_7 = arith.constant dense<0.000000e+00> : vector<1xf32>
    %30 = vector.multi_reduction <add>, %29, %cst_7 [1, 2] : vector<1x8x1xf32> to vector<1xf32>
    %31 = vector.shape_cast %30 : vector<1xf32> to vector<1x1x1xf32>
    %32 = vector.extract %31[0, 0, 0] : f32 from vector<1x1x1xf32>
    %33 = arith.extui %10 : vector<8x1xi1> to vector<8x1xi32>
    %34 = arith.sitofp %33 : vector<8x1xi32> to vector<8x1xf32>
    %35 = vector.shape_cast %34 : vector<8x1xf32> to vector<1x8x1xf32>
    %cst_8 = arith.constant dense<0.000000e+00> : vector<1xf32>
    %36 = vector.multi_reduction <add>, %35, %cst_8 [1, 2] : vector<1x8x1xf32> to vector<1xf32>
    %37 = vector.shape_cast %36 : vector<1xf32> to vector<1x1x1xf32>
    %38 = vector.extract %37[0, 0, 0] : f32 from vector<1x1x1xf32>
    %c0_9 = arith.constant 0 : index
    %c0_10 = arith.constant 0 : index
    %39 = vector.load %arg3[%c0_9, %c0_10] : memref<8x32xf32, #tpu.memory_space<vmem>>, vector<8x32xf32>
    %c0_11 = arith.constant 0 : index
    %c0_12 = arith.constant 0 : index
    %40 = vector.load %arg4[%c0_11, %c0_12] : memref<8x32xf32, #tpu.memory_space<vmem>>, vector<8x32xf32>
    %41 = arith.subf %39, %40 : vector<8x32xf32>
    %42 = arith.mulf %41, %41 : vector<8x32xf32>
    %cst_13 = arith.constant dense<0.000000e+00> : vector<8xf32>
    %43 = vector.multi_reduction <add>, %42, %cst_13 [1] : vector<8x32xf32> to vector<8xf32>
    %44 = vector.shape_cast %43 : vector<8xf32> to vector<8x1xf32>
    %cst_14 = arith.constant 0.000000e+00 : f32
    %45 = vector.broadcast %cst_14 : f32 to vector<8x1xf32>
    %46 = arith.select %7, %44, %45 : vector<8x1xi1>, vector<8x1xf32>
    %47 = vector.shape_cast %46 : vector<8x1xf32> to vector<1x8x1xf32>
    %cst_15 = arith.constant dense<0.000000e+00> : vector<1xf32>
    %48 = vector.multi_reduction <add>, %47, %cst_15 [1, 2] : vector<1x8x1xf32> to vector<1xf32>
    %49 = vector.shape_cast %48 : vector<1xf32> to vector<1x1x1xf32>
    %50 = vector.extract %49[0, 0, 0] : f32 from vector<1x1x1xf32>
    %51 = tpu.iota {dimensions = array<i32: 2>} : vector<1x8x384xi32>
    %c128_i32 = arith.constant 128 : i32
    %52 = vector.broadcast %c128_i32 : i32 to vector<1x8x384xi32>
    %53 = arith.cmpi slt, %51, %52 : vector<1x8x384xi32>
    %c256_i32 = arith.constant 256 : i32
    %54 = vector.broadcast %c256_i32 : i32 to vector<1x8x384xi32>
    %55 = arith.cmpi slt, %51, %54 : vector<1x8x384xi32>
    %56 = vector.broadcast %38 : f32 to vector<1x8x384xf32>
    %57 = vector.broadcast %50 : f32 to vector<1x8x384xf32>
    %58 = arith.select %55, %56, %57 : vector<1x8x384xi1>, vector<1x8x384xf32>
    %59 = vector.broadcast %32 : f32 to vector<1x8x384xf32>
    %60 = arith.select %53, %59, %58 : vector<1x8x384xi1>, vector<1x8x384xf32>
    %c0_16 = arith.constant 0 : index
    %c0_17 = arith.constant 0 : index
    %c0_18 = arith.constant 0 : index
    %61 = vector.load %arg5[%c0_16, %c0_17, %c0_18] : memref<1x8x384xf32, #tpu.memory_space<vmem>>, vector<1x8x384xf32>
    tpu.vector_store %arg5[%c0_16, %c0_17, %c0_18], %60 {strides = array<i32>} : memref<1x8x384xf32, #tpu.memory_space<vmem>>, vector<1x8x384xf32>,
    return
  }
  func.func @transform_0(%arg0: i32) -> (i32, i32) {
    %c0_i32 = arith.constant 0 : i32
    %c0_i32_0 = arith.constant 0 : i32
    return %arg0, %c0_i32 : i32, i32
  }
  func.func @transform_1(%arg0: i32) -> (i32, i32) {
    %c0_i32 = arith.constant 0 : i32
    %c0_i32_0 = arith.constant 0 : i32
    return %arg0, %c0_i32 : i32, i32
  }
  func.func @transform_2(%arg0: i32) -> (i32, i32) {
    %c0_i32 = arith.constant 0 : i32
    %c0_i32_0 = arith.constant 0 : i32
    return %arg0, %c0_i32 : i32, i32
  }
  func.func @transform_3(%arg0: i32) -> (i32, i32) {
    %c0_i32 = arith.constant 0 : i32
    %c0_i32_0 = arith.constant 0 : i32
    return %arg0, %c0_i32 : i32, i32
  }
  func.func @transform_4(%arg0: i32) -> (i32, i32, i32) {
    %c0_i32 = arith.constant 0 : i32
    %c0_i32_0 = arith.constant 0 : i32
    %c0_i32_1 = arith.constant 0 : i32
    return %arg0, %c0_i32, %c0_i32_0 : i32, i32, i32
  }
}

</mosaic_0001>

<bundles_post_ra>
// kernel: tpu_custom_call.1
= control target key start
LH: loop header
LB: loop body
LE: loop exit
PB: predicated region body
PF: predicated region fallthrough
CT: control target
= control target key end

     0   :  { %9 = vsyncpa [#allocation3], 0  ;;  %s713_s0 = inlined_call_operand.vmem [shape: f32[20,16], index: 0, kind: input, shape index: {}]   ;;  %s714_s1 = inlined_call_operand.vmem [shape: s32[20,1], index: 1, kind: input, shape index: {}]   ;;  %s715_s2 = inlined_call_operand.vmem [shape: f32[20,32], index: 2, kind: input, shape index: {}]   ;;  %s716_s3 = inlined_call_operand.vmem [shape: f32[20,32], index: 3, kind: input, shape index: {}]   ;;  %s717_s4 = inlined_call_operand.hbm [shape: f32[3,8,384], index: 4, kind: output, shape index: {}]  }
   0x1   :  { %11 = vsyncpa [#allocation3 + $0x1], 0  ;;  %s610_s15 = smov 0   ;;  %s612_s16 = smov 0  }
   0x2   :  { %s614_s17 = smov 0   ;;  %s616_s18 = smov 0  }
   0x3 LB: > { %s631_s19 = sadd.s32 4294967295, %s581_s18   ;;  %s452_s20 = sadd.s32 4294967294, %s581_s18   ;;  %s581_s18 = sphi %s616_s18, %s723_s18   ;;  %s577_s17 = sphi %s614_s17, %s722_s17   ;;  %s573_s16 = sphi %s612_s16, %s721_s16   ;;  %s569_s15 = sphi %s610_s15, %s720_s15  }
   0x4   : > { %s635_s21 = sadd.s32 1, %s581_s18   ;;  %s128_s22 = sadd.s32 1, %s577_s17 }
   0x5   : > { %s125_s23 = ssub.s32 %s581_s18, %s635_s21  ;;  %p138_p0 = scmp.ne.s32.totalorder %s577_s17, %s573_s16 }
   0x6   : > { %p126_p1 = scmp.eq.s32.totalorder %s125_s23, 0  ;;  %p139_p2 = scmp.eq.s32.totalorder %s631_s19, 2 }
   0x7   : > { %p144_p3 = scmp.ne.s32.totalorder %s573_s16, %s569_s15  ;;  %p145_p4 = scmp.eq.s32.totalorder %s452_s20, 2 }
   0x8   : > { %s646_s24 = scalar_select %p126_p1, %s577_s17, %s128_s22  }
   0x9   : > { %p648_p5 = por %p139_p2, %p138_p0  ;;  %p652_p6 = por %p145_p4, %p144_p3 }
   0xa   : > { %p455_p7 = scmp.ge.s32.totalorder %s581_s18, 1  ;;  %p191_p8 = scmp.lt.s32.totalorder %s581_s18, 4 }
   0xc   : > { %p192_p9 = pnand %p455_p7, %p191_p8 }
   0xd   : > { %p228_p10 = scmp.lt.s32.totalorder (!%p192_p9), %s631_s19, 2  ;;  %s460_s20 = sshll.u32 (!%p192_p9), %s631_s19, 3 }
   0xe   : > { %195 = sbr.rel (%p192_p9) target bundleno = 473 (0x1d9), region = 36  ;;  %s225_s22 = sand.u32 (!%p192_p9), 1, %s573_s16  }
   0xf   : > { %s465_s23 = smul.u32 (!%p192_p9), 24, %s225_s22 }
  0x11   : > { %s227_s30 = scalar_lea.vmem (!%p192_p9), [#allocation2], %s465_s23 }
  0x13   : > { %v583_v0 = vmov 0   ;;  %s229_s27 = scalar_select %p228_p10, %s631_s19, 2  ;;  %vm254_vm0 = vcmask 130048   ;;  %vm305_vm1 = vcmask 261120   ;;  %v246_v14 = vlaneseq }
  0x14   : > { %514 = vset.pattern.permute.xlu0 %v583_v0  ;;  %v249_v20 = vstv %s460_s20  ;;  %vm278_vm6 = vcmask 7168   ;;  %v584_v22 = vmov 0.0   ;;  %s539_s20 = scalar_lea.hbm %s717_s4, 72 }
  0x15   : > { %s456_s28 = sshll.u32 %s229_s27, 3  ;;  %v267_v15 = vand.u32 127, %v246_v14  ;;  %v247_v19 = vshrl.u32 %v246_v14, 7  ;;  %s472_s27 = smul.u32 24, %s631_s19 }
  0x16   : > { %s231_s5 = scalar_lea.vmem %s713_s0, %s456_s28  ;;  %s235_s8 = scalar_lea.vmem %s714_s1, %s456_s28 }
  0x17   : > { %v244_v1 = vld [vmem:[%s231_s5] sm:$0xff]  ;;  %s239_s11 = scalar_lea.vmem %s715_s2, %s456_s28  ;;  %s243_s14 = scalar_lea.vmem %s716_s3, %s456_s28  ;;  %v250_v21 = vadd.s32 %v249_v20, %v247_v19 }
  0x18   : > { %v255_v2 = vsel %vm254_vm0, %v244_v1, -inf  ;;  %v245_v3 = vld [vmem:[%s235_s8] sm:$0xff]  ;;  %s352_s7 = scalar_lea.hbm %s717_s4, %s472_s27  ;;  %s354_s8 = sshll.u32 %s227_s30, 4  ;;  %s355_s8 = int_to_ptr.vmem [resolvable:$true] %s354_s8 }
  0x19   : > { %256 = vmax.xlane.f32.xlu0 %v255_v2  ;;  %v301_v4 = vld [vmem:[%s239_s11] sm:$0xff]  ;;  %vm252_vm3 = vcmp.ne.s32.totalorder %v245_v3, 4294967196  ;;  %vm251_vm4 = vcmp.lt.s32.totalorder %v250_v21, 20  ;;  %s356_s9 = sshll.u32 %s352_s7, 4  ;;  %s341_s19 = scalar_lea.sflag [#allocation3], %s225_s22  ;;  %s357_s9 = int_to_ptr.hbm [resolvable:$true] %s356_s9 }
  0x1a   : > { %v302_v5 = vld [vmem:[%s243_s14] sm:$0xff]  ;;  %vm253_vm5 = vmand %vm251_vm4, %vm252_vm3  ;;  %s533_s11 = sshra.s32 %s357_s9, 4  ;;  %s534_s11 = int_to_ptr.hbm [resolvable:$true] %s533_s11 }
  0x1b   : > { %v303_v6 = vsub.f32 %v301_v4, %v302_v5  ;;  %v461_v23 = vsel %vm253_vm5, 1.0, %v584_v22  ;;  %s535_s12 = scalar_lea.hbm %s534_s11, 24  ;;  %p540_p0 = scmp.lt.s32.totalorder %s534_s11, %s717_s4 }
  0x1c   : > { %v291_v24 = vsel %vm278_vm6, %v461_v23, 0.0  ;;  %p536_p11 = scmp.ne.s32.totalorder %s534_s11, %s535_s12  ;;  %p541_p1 = scmp.lt.s32.totalorder %s539_s20, %s535_s12 }
  0x1d   : > { %v304_v7 = vmul.f32 %v303_v6, %v303_v6 }
  0x1e   : > { %p537_p12 = pnand %p536_p11, %p648_p5  ;;  %p542_p2 = por %p541_p1, %p540_p0 }
  0x1f   : > { %v306_v8 = vsel %vm305_vm1, %v304_v7, 0.0 }
  0x20   : > { %307 = vadd.xlane.f32.xlu2 %v306_v8  ;;  %p538_p13 = pneg %p537_p12 }
  0x22   : > { %p543_p3 = pnand %p542_p2, %p538_p13 }
  0x2d   : > { %269 = vperm.xlu0 %514, %v245_v3  }
  0x8c   : > { %v257_v9 = vpop.xlane.xlu0 %256 }
  0x8d   : > { %v258_v10 = vsub.f32 %v244_v1, %v257_v9 }
  0x8f   : > { %v259_v11 = vmul.f32 1.442695, %v258_v10 }
  0x91   : > { %515 = vpow2.f32 %v259_v11 }
  0x93   : > { %v308_v32 = vpop.xlane.xlu2 %307 }
  0x94   : > { %v309_v33 = vsel %vm251_vm4, %v308_v32, 0.0 }
  0x95   : > { %v310_v34 = vsel %vm278_vm6, %v309_v33, 0.0 }
  0x97   : > { %v516_v12 = vpop.eup %515 }
  0x98   : > { %v261_v13 = vsel %vm254_vm0, %v516_v12, 0.0 }
  0x99   : > { %262 = vadd.xlane.f32.xlu1 %v261_v13 }
  0x9f   : > { %v270_v16 = vpop.permute.xlu0 %269 }
  0xa0   : > { %vm271_vm2 = vcmp.eq.s32.totalorder %v267_v15, %v270_v16 }
  0xa1   : > { %v272_v17 = vsel %vm271_vm2, %v258_v10, 0.0 }
  0xa2   : > { %v273_v18 = vsel %vm254_vm0, %v272_v17, 0.0 }
  0xa3   : > { %274 = vadd.xlane.f32.xlu1 %v273_v18 }
  0xab   : > { %292 = vadd.xlane.f32.xlu1 %v291_v24 }
 0x10c   : > { %v263_v25 = vpop.xlane.xlu1 %262 }
 0x10d   : > { %517 = vlog2.f32 %v263_v25 }
 0x113   : > { %v518_v26 = vpop.eup %517 }
 0x114   : > { %v265_v27 = vmul.f32 0.6931472, %v518_v26 }
 0x116   : > { %v275_v28 = vpop.xlane.xlu1 %274 }
 0x117   : > { %v276_v29 = vsub.f32 %v265_v27, %v275_v28 }
 0x119   : > { %v277_v30 = vsel %vm253_vm5, %v276_v29, 0.0 }
 0x11a   : > { %v279_v31 = vsel %vm278_vm6, %v277_v30, 0.0 }
 0x11b   : > { %280 = vadd.xlane.f32.xlu2 %v279_v31 }
 0x11e   : > { %v293_v35 = vpop.xlane.xlu1 %292 }
 0x11f   : > { %v294_v36 = vrot.slane %v293_v35, 4 }
 0x121   : > { %v295_v37 = vadd.f32 %v294_v36, %v293_v35 }
 0x123   : > { %311 = vadd.xlane.f32.xlu2 %v310_v34  ;;  %v296_v38 = vrot.slane %v295_v37, 2 }
 0x125   : > { %v297_v41 = vadd.f32 %v296_v38, %v295_v37 }
 0x127   : > { %v298_v44 = vrot.slane %v297_v41, 1 }
 0x129   : > { %v299_v49 = vadd.f32 %v298_v44, %v297_v41 }
 0x18e   : > { %v281_v39 = vpop.xlane.xlu2 %280 }
 0x18f   : > { %v282_v40 = vrot.slane %v281_v39, 4 }
 0x191   : > { %v283_v42 = vadd.f32 %v282_v40, %v281_v39 }
 0x193   : > { %v284_v43 = vrot.slane %v283_v42, 2 }
 0x195   : > { %v285_v45 = vadd.f32 %v284_v43, %v283_v42 }
 0x196   : > { %v312_v46 = vpop.xlane.xlu2 %311 }
 0x197   : > { %v313_v47 = vrot.slane %v312_v46, 4  ;;  %v286_v48 = vrot.slane %v285_v45, 1 }
 0x199   : > { %v314_v50 = vadd.f32 %v313_v47, %v312_v46  ;;  %v287_v51 = vadd.f32 %v286_v48, %v285_v45 }
 0x19b   : > { %v315_v52 = vrot.slane %v314_v50, 2  ;;  %466 = vpush %v287_v51 }
 0x19c   : > { %468 = vpush %v299_v49 }
 0x19d   : > { %v316_v53 = vadd.f32 %v315_v52, %v314_v50 }
 0x19f   : > { %v317_v54 = vrot.slane %v316_v53, 1 }
 0x1a1   : > { %v318_v55 = vadd.f32 %v317_v54, %v316_v53 }
 0x1a3   : > { %470 = vpush %v318_v55 }
 0x1cc   : > { %s467_s28 = spop %466 }
 0x1cd   : > { %v333_v56 = vstv %s467_s28  ;;  %s469_s29 = spop %468 }
 0x1ce   : > { %337 = vst [vmem:[%s227_s30] sm:$0xff] %v333_v56  ;;  %v328_v57 = vstv %s469_s29 }
 0x1cf   : > { %338 = vst [vmem:[%s227_s30 + $0x8] sm:$0xff] %v328_v57 }
 0x1d4   : > { %s471_s10 = spop %470 }
 0x1d5   : > { %v329_v58 = vstv %s471_s10 }
 0x1d6   : > { %339 = vst [vmem:[%s227_s30 + $0x10] sm:$0xff] %v329_v58 }
 0x1d7   : > { %546 = shalt.err (!%p543_p3)
}
 0x1d8   : > { %473 = dma.vmem_to_hbm [thread:$0]  (%p648_p5), %s355_s8, 384, %s357_s9, %s341_s19  }
 0x1d9 PF: > { %p479_p4 = scmp.ge.s32.totalorder %s581_s18, 2  ;;  %s368_s22 = sand.u32 1, %s569_s15  }
 0x1da   : > { %s369_s28 = scalar_lea.sflag [#allocation3], %s368_s22 }
 0x1db   : > { %p476_p7 = pnand %p479_p4, %p652_p6 }
 0x1dd   : > { %p477_p8 = pneg %p476_p7 }
 0x1df   : > { %564 = dma.done.wait (%p477_p8), %s369_s28, 384  }
 0x1e0   : > { %566 = vsyncadd (%p477_p8), %s369_s28, 4294966912  ;;  %p14_p9 = scmp.ge.s32.totalorder %s635_s21, 5   ;;  %s720_s15 = smov %s573_s16 }
 0x1e1   : > { %s721_s16 = smov %s577_s17  ;;  %s722_s17 = smov %s646_s24 }
 0x1e2   : > { %s723_s18 = smov %s635_s21  ;;  %16 = sbr.rel (!%p14_p9) target bundleno = 3 (0x3), region = 80 }
 0x1e7   :  { %375 = vsyncpa [#allocation3], 1 }
 0x1e8   :  { %377 = vsyncpa [#allocation3 + $0x1], 1 }

</bundles_post_ra>
